<compile_context>
chip_gen: v6e
topology: v6e:2x2x1
jax: 0.10.0
libtpu: 0.0.40
codegen_flags: <defaults>
</compile_context>

<pallas_src>
import functools

import jax
import jax.numpy as jnp
from jax.experimental import pallas as pl
from jax.experimental.pallas import tpu as pltpu


def _rup(x, m):
    return (x + m - 1) // m * m


# ----------------------------------------------------------------------------
# Pallas kernels
# ----------------------------------------------------------------------------

def _linear_kernel(x_ref, w_ref, b_ref, o_ref, acc_ref, *, relu):
    @pl.when(pl.program_id(2) == 0)
    def _():
        acc_ref[...] = jnp.zeros_like(acc_ref)

    acc_ref[...] += jnp.dot(x_ref[...], w_ref[...], preferred_element_type=jnp.float32)

    @pl.when(pl.program_id(2) == pl.num_programs(2) - 1)
    def _():
        out = acc_ref[...] + b_ref[...]
        if relu:
            out = jnp.maximum(out, 0.0)
        o_ref[...] = out


def linear_pallas(x, w_pad, b_pad, n_out, *, relu=False):
    """y = relu?(x @ w + b).  w_pad/b_pad are pre-padded (K128,N128) bf16 / (1,N128) f32."""
    M, K = x.shape
    Kp, Np = w_pad.shape
    Mp = _rup(M, 8)
    if Mp > 256:
        Mp = _rup(Mp, 256)
        tm = 256
    else:
        tm = Mp
    tn = Np if Np <= 512 else 256
    tk = Kp if Kp <= 512 else 256
    xp = jnp.pad(x.astype(jnp.float32), ((0, Mp - M), (0, Kp - K))).astype(jnp.bfloat16)
    out = pl.pallas_call(
        functools.partial(_linear_kernel, relu=relu),
        out_shape=jax.ShapeDtypeStruct((Mp, Np), jnp.float32),
        grid=(Mp // tm, Np // tn, Kp // tk),
        in_specs=[
            pl.BlockSpec((tm, tk), lambda i, j, k: (i, k)),
            pl.BlockSpec((tk, tn), lambda i, j, k: (k, j)),
            pl.BlockSpec((1, tn), lambda i, j, k: (0, j)),
        ],
        out_specs=pl.BlockSpec((tm, tn), lambda i, j, k: (i, j)),
        scratch_shapes=[pltpu.VMEM((tm, tn), jnp.float32)],
        compiler_params=pltpu.CompilerParams(
            dimension_semantics=("parallel", "parallel", "arbitrary")),
    )(xp, w_pad, b_pad)
    return out[:M, :n_out]


def _mlp2_kernel(x_ref, w1_ref, b1_ref, w2_ref, b2_ref, o_ref):
    # layer 1 (bf16 MXU, f32 acc) + bias + ReLU, layer 2 chained in VMEM.
    h = jnp.dot(x_ref[...], w1_ref[...], preferred_element_type=jnp.float32) + b1_ref[...]
    h = jnp.maximum(h, 0.0)
    o_ref[...] = (jnp.dot(h.astype(jnp.bfloat16), w2_ref[...],
                          preferred_element_type=jnp.float32) + b2_ref[...])


def mlp2_pallas(x, w1_pad, b1_pad, w2_pad, b2_pad, n_out):
    """out = relu(x @ w1 + b1) @ w2 + b2 in one pallas_call (hidden stays in VMEM)."""
    M, K = x.shape
    K1p, Hp = w1_pad.shape
    _, N2p = w2_pad.shape
    Mp = _rup(M, 8)
    if Mp > 256:
        Mp = _rup(Mp, 256)
        tm = 256
    else:
        tm = Mp
    xp = jnp.pad(x.astype(jnp.float32), ((0, Mp - M), (0, K1p - K))).astype(jnp.bfloat16)
    out = pl.pallas_call(
        _mlp2_kernel,
        out_shape=jax.ShapeDtypeStruct((Mp, N2p), jnp.float32),
        grid=(Mp // tm,),
        in_specs=[
            pl.BlockSpec((tm, K1p), lambda i: (i, 0)),
            pl.BlockSpec((K1p, Hp), lambda i: (0, 0)),
            pl.BlockSpec((1, Hp), lambda i: (0, 0)),
            pl.BlockSpec((Hp, N2p), lambda i: (0, 0)),
            pl.BlockSpec((1, N2p), lambda i: (0, 0)),
        ],
        out_specs=pl.BlockSpec((tm, N2p), lambda i: (i, 0)),
        compiler_params=pltpu.CompilerParams(dimension_semantics=("parallel",)),
    )(xp, w1_pad, b1_pad, w2_pad, b2_pad)
    return out[:M, :n_out]


def _iou_kernel(anc_ref, gt_ref, o_ref):
    anc = anc_ref[0]                                   # (4, A)  A on lanes
    gt = gt_ref[0]                                     # (G, 4)
    ax1, ay1, ax2, ay2 = anc[0:1, :], anc[1:2, :], anc[2:3, :], anc[3:4, :]   # (1, A)
    gx1, gy1, gx2, gy2 = gt[:, 0:1], gt[:, 1:2], gt[:, 2:3], gt[:, 3:4]       # (G, 1)
    ix1 = jnp.maximum(ax1, gx1)
    iy1 = jnp.maximum(ay1, gy1)
    ix2 = jnp.minimum(ax2, gx2)
    iy2 = jnp.minimum(ay2, gy2)
    inter = jnp.maximum(ix2 - ix1, 0.0) * jnp.maximum(iy2 - iy1, 0.0)          # (G, A)
    area_a = (ax2 - ax1) * (ay2 - ay1)                                          # (1, A)
    area_g = (gx2 - gx1) * (gy2 - gy1)                                          # (G, 1)
    o_ref[0] = inter / (area_a + area_g - inter + 1e-9)


def iou_pallas(anc_t, gt):
    """Pairwise IoU: anchors (B, 4, A) x gt (B, G, 4) -> (B, G, A), A on lane axis."""
    B, _, A = anc_t.shape
    G = gt.shape[1]
    return pl.pallas_call(
        _iou_kernel,
        out_shape=jax.ShapeDtypeStruct((B, G, A), jnp.float32),
        grid=(B,),
        in_specs=[pl.BlockSpec((1, 4, A), lambda b: (b, 0, 0)),
                  pl.BlockSpec((1, G, 4), lambda b: (b, 0, 0))],
        out_specs=pl.BlockSpec((1, G, A), lambda b: (b, 0, 0)),
        compiler_params=pltpu.CompilerParams(dimension_semantics=("parallel",)),
    )(anc_t, gt)


def _roi_pool_kernel(ind_ref, feat_ref, mask_ref, o_ref, *, n_bins):
    # roi_pool (max per bin) followed by AvgPool2d over the roi grid.  f32 only.
    del ind_ref  # consumed by the index_map (scalar-prefetch gather)
    feat = feat_ref[0]                                  # (HW, C)
    mask = mask_ref[0]                                  # (HW, n_bins)
    neg = jnp.full_like(feat, -1e30)                    # hoisted sentinel (f32)
    acc = jnp.zeros((1, feat.shape[1]), jnp.float32)
    for b in range(n_bins):
        m = mask[:, b:b + 1]                            # (HW, 1)
        masked = jnp.where(m > 0, feat, neg)
        bmax = jnp.max(masked, axis=0, keepdims=True)   # (1, C)
        nonempty = (jnp.sum(m, axis=0, keepdims=True) > 0).astype(jnp.float32)
        acc = acc + bmax * nonempty                     # empty bin -> 0 (torchvision behaviour)
    o_ref[...] = acc / float(n_bins)


def roi_pool_avg_pallas(feat_flat, masks, roi_batch_idx):
    """feat_flat (B, HW, C), masks (P, HW, n_bins), roi_batch_idx (P,) -> (P, C).

    The per-ROI batch slab is gathered by the feature index_map via scalar
    prefetch (no jnp.take copy of the feature map per ROI)."""
    B, HW, C = feat_flat.shape
    P, _, n_bins = masks.shape
    grid_spec = pltpu.PrefetchScalarGridSpec(
        num_scalar_prefetch=1,
        grid=(P,),
        in_specs=[pl.BlockSpec((1, HW, C), lambda p, ind: (ind[p], 0, 0)),
                  pl.BlockSpec((1, HW, n_bins), lambda p, ind: (p, 0, 0))],
        out_specs=pl.BlockSpec((1, C), lambda p, ind: (p, 0)),
    )
    return pl.pallas_call(
        functools.partial(_roi_pool_kernel, n_bins=n_bins),
        out_shape=jax.ShapeDtypeStruct((P, C), jnp.float32),
        grid_spec=grid_spec,
        compiler_params=pltpu.CompilerParams(dimension_semantics=("arbitrary",)),
    )(roi_batch_idx.astype(jnp.int32), feat_flat, masks)


def _losses_kernel(conf_ref, tgt_ref, off_ref, gtoff_ref, cls_ref, oh_ref,
                   bce_ref, sl1_ref, ce_ref, *, beta):
    # BCE-with-logits (sum)
    x = conf_ref[...]
    t = tgt_ref[...]
    bce = jnp.maximum(x, 0.0) - x * t + jnp.log(1.0 + jnp.exp(-jnp.abs(x)))
    bce_ref[...] = jnp.sum(jnp.sum(bce, axis=1, keepdims=True), axis=0, keepdims=True)
    # Smooth-L1 (sum)
    d = off_ref[...] - gtoff_ref[...]
    ad = jnp.abs(d)
    sl1 = jnp.where(ad < beta, 0.5 * d * d / beta, ad - 0.5 * beta)
    sl1_ref[...] = jnp.sum(jnp.sum(sl1, axis=1, keepdims=True), axis=0, keepdims=True)
    # Cross-entropy (sum)
    lg = cls_ref[...]
    oh = oh_ref[...]
    m = jnp.max(lg, axis=1, keepdims=True)
    lse = m + jnp.log(jnp.sum(jnp.exp(lg - m), axis=1, keepdims=True))
    picked = jnp.sum(oh * lg, axis=1, keepdims=True)
    ce_ref[...] = jnp.sum(lse - picked, axis=0, keepdims=True)


def losses_pallas(conf_logits, conf_targets, off_pred, off_gt, cls_logits, onehot, beta):
    """One pallas_call computing BCE-sum, SmoothL1-sum and CE-sum (3 scalar outputs)."""
    conf = conf_logits.reshape(1, -1).astype(jnp.float32)
    tgt = conf_targets.reshape(1, -1).astype(jnp.float32)
    off_pred = off_pred.astype(jnp.float32)
    off_gt = off_gt.astype(jnp.float32)
    cls_logits = cls_logits.astype(jnp.float32)
    onehot = onehot.astype(jnp.float32)
    bce, sl1, ce = pl.pallas_call(
        functools.partial(_losses_kernel, beta=beta),
        out_shape=(jax.ShapeDtypeStruct((1, 1), jnp.float32),
                   jax.ShapeDtypeStruct((1, 1), jnp.float32),
                   jax.ShapeDtypeStruct((1, 1), jnp.float32)),
        grid=(1,),
        in_specs=[pl.BlockSpec(conf.shape, lambda i: (0, 0)),
                  pl.BlockSpec(tgt.shape, lambda i: (0, 0)),
                  pl.BlockSpec(off_pred.shape, lambda i: (0, 0)),
                  pl.BlockSpec(off_gt.shape, lambda i: (0, 0)),
                  pl.BlockSpec(cls_logits.shape, lambda i: (0, 0)),
                  pl.BlockSpec(onehot.shape, lambda i: (0, 0))],
        out_specs=(pl.BlockSpec((1, 1), lambda i: (0, 0)),
                   pl.BlockSpec((1, 1), lambda i: (0, 0)),
                   pl.BlockSpec((1, 1), lambda i: (0, 0))),
        compiler_params=pltpu.CompilerParams(dimension_semantics=("arbitrary",)),
    )(conf, tgt, off_pred, off_gt, cls_logits, onehot)
    return bce[0, 0], sl1[0, 0], ce[0, 0]


# ----------------------------------------------------------------------------
# Model glue (plain JAX: anchor generation, indexing, reshapes, im2col)
# ----------------------------------------------------------------------------

def init_params(key, out_channels, n_classes, scale, hidden_dim=512, n_anchors=9):
    """All GEMM weights are pre-padded to (K128, N128) and cast to bf16 once."""
    ks = jax.random.split(key, 6)

    def padw(w):
        K, N = w.shape
        return jnp.pad(w, ((0, _rup(K, 128) - K), (0, _rup(N, 128) - N))).astype(jnp.bfloat16)

    def padb(n):
        return jnp.zeros((1, _rup(n, 128)), jnp.float32)

    p = {}
    # TODO(synk): FeatureExtractor is a pretrained ResNet-50 in the reference;
    # replaced by a single strided "patchify" conv (stride == img/feature scale
    # factor) since pretrained weights cannot be loaded in-script.
    p["backbone_w"] = padw(0.05 * jax.random.normal(ks[0], (scale * scale * 3, out_channels), jnp.float32))
    p["backbone_b"] = padb(out_channels)
    p["conv1_w"] = padw(0.05 * jax.random.normal(ks[1], (9 * out_channels, hidden_dim), jnp.float32))
    p["conv1_b"] = padb(hidden_dim)
    # conf (9) and reg (36) heads fused into one (hidden_dim, 45) weight.
    conf_w = 0.05 * jax.random.normal(ks[2], (hidden_dim, n_anchors), jnp.float32)
    reg_w = 0.01 * jax.random.normal(ks[3], (hidden_dim, n_anchors * 4), jnp.float32)
    p["head_w"] = padw(jnp.concatenate([conf_w, reg_w], axis=1))
    p["head_b"] = padb(5 * n_anchors)
    p["fc_w"] = padw(0.05 * jax.random.normal(ks[4], (out_channels, hidden_dim), jnp.float32))
    p["fc_b"] = padb(hidden_dim)
    p["cls_w"] = padw(0.05 * jax.random.normal(ks[5], (hidden_dim, n_classes), jnp.float32))
    p["cls_b"] = padb(n_classes)
    return p


def feature_extractor(params, images, scale, out_channels):
    """images NCHW -> feature map NHWC, via strided patchify conv (tiled Pallas GEMM)."""
    B, C, H, W = images.shape
    oh, ow = H // scale, W // scale
    x = jnp.transpose(images, (0, 2, 3, 1))                       # NHWC
    x = x.reshape(B, oh, scale, ow, scale, C)
    x = jnp.transpose(x, (0, 1, 3, 2, 4, 5)).reshape(B * oh * ow, scale * scale * C)
    feat = linear_pallas(x, params["backbone_w"], params["backbone_b"], out_channels, relu=True)
    return feat.reshape(B, oh, ow, out_channels)


def proposal_module(params, feat_nhwc, n_anchors=9):
    """conv1(3x3,pad1)+ReLU and the fused conf/reg head as ONE two-layer Pallas kernel."""
    B, Hf, Wf, C = feat_nhwc.shape
    # TODO(synk): im2col stays host-side (9x feature-map HBM traffic) — acceptable at
    # these sizes; a VMEM-resident shifted-accumulation conv is the next step for large maps.
    xpad = jnp.pad(feat_nhwc, ((0, 0), (1, 1), (1, 1), (0, 0)))
    patches = jnp.stack([xpad[:, i:i + Hf, j:j + Wf, :]
                         for i in range(3) for j in range(3)], axis=3)
    patches = patches.reshape(B * Hf * Wf, 9 * C)
    # TODO(synk): nn.Dropout(p=0.3) before ReLU is treated as identity (deterministic / eval behaviour).
    out = mlp2_pallas(patches, params["conv1_w"], params["conv1_b"],
                      params["head_w"], params["head_b"], n_out=5 * n_anchors)
    conf = out[:, :n_anchors]
    reg = out[:, n_anchors:5 * n_anchors]
    conf_nchw = jnp.transpose(conf.reshape(B, Hf, Wf, n_anchors), (0, 3, 1, 2))
    reg_nchw = jnp.transpose(reg.reshape(B, Hf, Wf, 4 * n_anchors), (0, 3, 1, 2))
    return conf_nchw, reg_nchw


def gen_anc_base(out_h, out_w, scales, ratios):
    ys = jnp.arange(out_h, dtype=jnp.float32) + 0.5
    xs = jnp.arange(out_w, dtype=jnp.float32) + 0.5
    ws = jnp.array([s * r for s in scales for r in ratios], jnp.float32)
    hs = jnp.array([float(s) for s in scales for _ in ratios], jnp.float32)
    xc = xs[None, :, None]
    yc = ys[:, None, None]
    xmin = jnp.clip(xc - ws / 2.0, 0.0, float(out_w))
    xmax = jnp.clip(xc + ws / 2.0, 0.0, float(out_w))
    ymin = jnp.clip(yc - hs / 2.0, 0.0, float(out_h))
    ymax = jnp.clip(yc + hs / 2.0, 0.0, float(out_h))
    return jnp.stack(jnp.broadcast_arrays(xmin, ymin, xmax, ymax), axis=-1)  # (H, W, 9, 4)


def encode_offsets(anc, gt):
    aw = anc[:, 2] - anc[:, 0]
    ah = anc[:, 3] - anc[:, 1]
    acx = anc[:, 0] + aw / 2.0
    acy = anc[:, 1] + ah / 2.0
    gw = gt[:, 2] - gt[:, 0]
    gh = gt[:, 3] - gt[:, 1]
    gcx = gt[:, 0] + gw / 2.0
    gcy = gt[:, 1] + gh / 2.0
    return jnp.stack([(gcx - acx) / aw, (gcy - acy) / ah,
                      jnp.log(gw / aw), jnp.log(gh / ah)], axis=-1)


def generate_proposals(anchors, offsets):
    aw = anchors[:, 2] - anchors[:, 0]
    ah = anchors[:, 3] - anchors[:, 1]
    acx = anchors[:, 0] + aw / 2.0
    acy = anchors[:, 1] + ah / 2.0
    pcx = acx + offsets[:, 0] * aw
    pcy = acy + offsets[:, 1] * ah
    pw = aw * jnp.exp(offsets[:, 2])
    ph = ah * jnp.exp(offsets[:, 3])
    return jnp.stack([pcx - pw / 2.0, pcy - ph / 2.0, pcx + pw / 2.0, pcy + ph / 2.0], axis=-1)


def build_roi_masks(boxes, Hf, Wf, rs):
    """torchvision roi_pool binning (spatial_scale=1) expressed as per-bin {0,1} masks."""
    x1 = jnp.round(boxes[:, 0]); y1 = jnp.round(boxes[:, 1])
    x2 = jnp.round(boxes[:, 2]); y2 = jnp.round(boxes[:, 3])
    roi_w = jnp.maximum(x2 - x1 + 1.0, 1.0)
    roi_h = jnp.maximum(y2 - y1 + 1.0, 1.0)
    bin_w = roi_w / rs
    bin_h = roi_h / rs
    b = jnp.arange(rs, dtype=jnp.float32)
    hstart = jnp.clip(jnp.floor(b[None, :] * bin_h[:, None]) + y1[:, None], 0, Hf)
    hend = jnp.clip(jnp.ceil((b[None, :] + 1.0) * bin_h[:, None]) + y1[:, None], 0, Hf)
    wstart = jnp.clip(jnp.floor(b[None, :] * bin_w[:, None]) + x1[:, None], 0, Wf)
    wend = jnp.clip(jnp.ceil((b[None, :] + 1.0) * bin_w[:, None]) + x1[:, None], 0, Wf)
    hh = jnp.arange(Hf, dtype=jnp.float32)
    ww = jnp.arange(Wf, dtype=jnp.float32)
    hmask = (hh[None, None, :] >= hstart[:, :, None]) & (hh[None, None, :] < hend[:, :, None])  # (P, rs, Hf)
    wmask = (ww[None, None, :] >= wstart[:, :, None]) & (ww[None, None, :] < wend[:, :, None])  # (P, rs, Wf)
    mask = hmask[:, :, None, :, None] & wmask[:, None, :, None, :]                              # (P, rs, rs, Hf, Wf)
    P = boxes.shape[0]
    mask = mask.reshape(P, rs * rs, Hf * Wf).astype(jnp.float32)
    return jnp.transpose(mask, (0, 2, 1))   # (P, HW, n_bins)


def two_stage_detector_forward(params, images, gt_bboxes, gt_classes, cfg):
    B = images.shape[0]
    scale, out_channels = cfg["scale"], cfg["out_channels"]
    out_h, out_w = cfg["out_size"]
    n_anchors = cfg["n_anchors"]

    # ---------------- RegionProposalNetwork ----------------
    feat_nhwc = feature_extractor(params, images, scale, out_channels)            # (B, oh, ow, C)

    anc_base = gen_anc_base(out_h, out_w, cfg["anc_scales"], cfg["anc_ratios"])   # (oh, ow, 9, 4)
    A = out_h * out_w * n_anchors
    anc_single = anc_base.reshape(A, 4)
    anc_t = jnp.broadcast_to(jnp.transpose(anc_single, (1, 0))[None], (B, 4, A))  # A on lane axis
    gt_proj = gt_bboxes / jnp.array([cfg["w_scale"], cfg["h_scale"],
                                     cfg["w_scale"], cfg["h_scale"]], jnp.float32)

    # --- get_req_anchors (fixed-size, deterministic variant) ---
    iou = iou_pallas(anc_t, gt_proj)                                              # (B, G, A)
    G = gt_proj.shape[1]
    pos_per_gt = jnp.argmax(iou, axis=2)                                          # (B, G)
    positive_anc_ind = (jnp.arange(B)[:, None] * A + pos_per_gt).reshape(-1)      # (B*G,)
    positive_anc_ind_sep = positive_anc_ind // A
    anc_all = jnp.broadcast_to(anc_single[None], (B, A, 4)).reshape(B * A, 4)
    positive_anc_coords = anc_all[positive_anc_ind]
    gt_matched = gt_proj.reshape(B * G, 4)
    GT_class_pos = gt_classes.reshape(-1)
    GT_offsets = encode_offsets(positive_anc_coords, gt_matched)
    n_pos = positive_anc_ind.shape[0]
    max_iou_per_anc = jnp.max(iou, axis=1).reshape(-1)                            # (B*A,)
    # TODO(synk): reference randomly samples negatives (IoU < 0.3) and also adds all
    # anchors with IoU > 0.7 as positives (variable-length, data-dependent shapes);
    # here one positive per GT and the lowest-IoU anchors as negatives, deterministically.
    _, negative_anc_ind = jax.lax.top_k(-max_iou_per_anc, n_pos)

    # --- ProposalModule (train mode) ---
    conf_pred, reg_pred = proposal_module(params, feat_nhwc, n_anchors)           # NCHW
    conf_flat = conf_pred.reshape(-1)
    conf_pos = conf_flat[positive_anc_ind]
    conf_neg = conf_flat[negative_anc_ind]
    offsets_pos = reg_pred.reshape(-1, 4)[positive_anc_ind]
    proposals = generate_proposals(positive_anc_coords, offsets_pos)

    # ---------------- ClassificationModule ----------------
    # pos_proposals_list built per batch index; with a fixed positive count per
    # image (sorted sep) the concatenation is exactly `proposals` in order.
    masks = build_roi_masks(proposals, out_h, out_w, cfg["roi_size"])             # (P, HW, bins)
    feat_flat = feat_nhwc.reshape(B, out_h * out_w, out_channels)
    roi_out = roi_pool_avg_pallas(feat_flat, masks, positive_anc_ind_sep)         # (P, C)
    # TODO(synk): classifier Dropout(p=0.3) treated as identity (deterministic).
    cls_scores = mlp2_pallas(roi_out, params["fc_w"], params["fc_b"],
                             params["cls_w"], params["cls_b"], n_out=cfg["n_classes"])

    # ---------------- Losses (single fused kernel) ----------------
    inputs = jnp.concatenate([conf_pos, conf_neg])
    targets = jnp.concatenate([jnp.ones_like(conf_pos), jnp.zeros_like(conf_neg)])
    onehot = jax.nn.one_hot(GT_class_pos, cfg["n_classes"], dtype=jnp.float32)
    bce_sum, sl1_sum, ce_sum = losses_pallas(inputs, targets, offsets_pos, GT_offsets,
                                             cls_scores, onehot, beta=1.0 / 9.0)
    cls_loss_rpn = bce_sum / B
    reg_loss = sl1_sum / n_pos
    total_rpn_loss = cfg["w_conf"] * cls_loss_rpn + cfg["w_reg"] * reg_loss
    cls_loss = ce_sum / n_pos

    return cls_loss, total_rpn_loss


# ----------------------------------------------------------------------------
if __name__ == "__main__":
    key = jax.random.PRNGKey(0)
    B = 2
    img_size = (64, 64)
    out_size = (8, 8)
    out_channels = 16
    n_classes = 4
    roi_size = 2
    scale = img_size[0] // out_size[0]

    cfg = dict(
        scale=scale,
        out_channels=out_channels,
        out_size=out_size,
        n_anchors=9,
        anc_scales=[2, 4, 6],
        anc_ratios=[0.5, 1.0, 1.5],
        w_scale=img_size[1] // out_size[1],
        h_scale=img_size[0] // out_size[0],
        w_conf=1.0,
        w_reg=5.0,
        roi_size=roi_size,
        n_classes=n_classes,
    )

    k_img, k_par = jax.random.split(key)
    images = jax.random.normal(k_img, (B, 3, img_size[0], img_size[1]), jnp.float32)
    gt_bboxes = jnp.array(
        [[[8.0, 8.0, 40.0, 40.0], [16.0, 24.0, 56.0, 56.0]],
         [[4.0, 12.0, 36.0, 44.0], [24.0, 8.0, 60.0, 40.0]]], jnp.float32)   # (B, 2, 4) xyxy pixels
    gt_classes = jnp.array([[1, 3], [0, 2]], jnp.int32)

    params = init_params(k_par, out_channels, n_classes, scale)

    cls_loss, total_rpn_loss = two_stage_detector_forward(params, images, gt_bboxes, gt_classes, cfg)
    jax.block_until_ready((cls_loss, total_rpn_loss))
    print("KERNEL_OK")
</pallas_src>

<mosaic_0001>
module attributes {stable_mosaic.version = 11 : i64} {
  func.func @_linear_kernel(%arg0: i32, %arg1: i32, %arg2: i32, %arg3: memref<128x256xbf16, #tpu.memory_space<vmem>>, %arg4: memref<256x128xbf16, #tpu.memory_space<vmem>>, %arg5: memref<1x128xf32, #tpu.memory_space<vmem>>, %arg6: memref<128x128xf32, #tpu.memory_space<vmem>>, %arg7: memref<128x128xf32, #tpu.memory_space<vmem>>) attributes {dimension_semantics = [#tpu.dimension_semantics<parallel>, #tpu.dimension_semantics<parallel>, #tpu.dimension_semantics<arbitrary>], iteration_bounds = array<i64: 1, 1, 1>, scalar_prefetch = 0 : i64, scratch_operands = 1 : i64, tpu.core_type = #tpu.core_type<tc>, window_params = [{transform_indices = @transform_0, window_bounds = array<i64: 128, 256>}, {transform_indices = @transform_1, window_bounds = array<i64: 256, 128>}, {transform_indices = @transform_2, window_bounds = array<i64: 1, 128>}, {transform_indices = @transform_3, window_bounds = array<i64: 128, 128>}]} {
    %c0_i32 = arith.constant 0 : i32
    %0 = arith.cmpi eq, %arg2, %c0_i32 : i32
    %1 = arith.extui %0 : i1 to i32
    %c0_i32_0 = arith.constant 0 : i32
    %2 = arith.cmpi ne, %1, %c0_i32_0 : i32
    scf.if %2 {
      %cst_10 = arith.constant 0.000000e+00 : f32
      %12 = vector.broadcast %cst_10 : f32 to vector<128x128xf32>
      %c0_11 = arith.constant 0 : index
      %c0_12 = arith.constant 0 : index
      %13 = vector.load %arg7[%c0_11, %c0_12] : memref<128x128xf32, #tpu.memory_space<vmem>>, vector<128x128xf32>
      tpu.vector_store %arg7[%c0_11, %c0_12], %12 {strides = array<i32>} : memref<128x128xf32, #tpu.memory_space<vmem>>, vector<128x128xf32>,
    } else {
    }
    %c0 = arith.constant 0 : index
    %c0_1 = arith.constant 0 : index
    %3 = vector.load %arg7[%c0, %c0_1] : memref<128x128xf32, #tpu.memory_space<vmem>>, vector<128x128xf32>
    %c0_2 = arith.constant 0 : index
    %c0_3 = arith.constant 0 : index
    %4 = vector.load %arg3[%c0_2, %c0_3] : memref<128x256xbf16, #tpu.memory_space<vmem>>, vector<128x256xbf16>
    %c0_4 = arith.constant 0 : index
    %c0_5 = arith.constant 0 : index
    %5 = vector.load %arg4[%c0_4, %c0_5] : memref<256x128xbf16, #tpu.memory_space<vmem>>, vector<256x128xbf16>
    %cst = arith.constant dense<0.000000e+00> : vector<128x128xf32>
    %6 = tpu.matmul %4, %5, %cst {dimension_numbers = #tpu.dot_dimension_numbers<[1], [0], [0], [1], [0, 0, 1, 1], [], []>} : vector<128x256xbf16>, vector<256x128xbf16>, vector<128x128xf32> -> vector<128x128xf32>
    %7 = arith.addf %3, %6 : vector<128x128xf32>
    %c0_6 = arith.constant 0 : index
    %c0_7 = arith.constant 0 : index
    %8 = vector.load %arg7[%c0_6, %c0_7] : memref<128x128xf32, #tpu.memory_space<vmem>>, vector<128x128xf32>
    tpu.vector_store %arg7[%c0_6, %c0_7], %7 {strides = array<i32>} : memref<128x128xf32, #tpu.memory_space<vmem>>, vector<128x128xf32>,
    %c0_i32_8 = arith.constant 0 : i32
    %9 = arith.cmpi eq, %arg2, %c0_i32_8 : i32
    %10 = arith.extui %9 : i1 to i32
    %c0_i32_9 = arith.constant 0 : i32
    %11 = arith.cmpi ne, %10, %c0_i32_9 : i32
    scf.if %11 {
      %c0_10 = arith.constant 0 : index
      %c0_11 = arith.constant 0 : index
      %12 = vector.load %arg7[%c0_10, %c0_11] : memref<128x128xf32, #tpu.memory_space<vmem>>, vector<128x128xf32>
      %c0_12 = arith.constant 0 : index
      %c0_13 = arith.constant 0 : index
      %13 = vector.load %arg5[%c0_12, %c0_13] : memref<1x128xf32, #tpu.memory_space<vmem>>, vector<1x128xf32>
      %14 = vector.broadcast %13 : vector<1x128xf32> to vector<128x128xf32>
      %15 = arith.addf %12, %14 : vector<128x128xf32>
      %cst_14 = arith.constant 0.000000e+00 : f32
      %16 = vector.broadcast %cst_14 : f32 to vector<128x128xf32>
      %17 = arith.maximumf %15, %16 : vector<128x128xf32>
      %c0_15 = arith.constant 0 : index
      %c0_16 = arith.constant 0 : index
      %18 = vector.load %arg6[%c0_15, %c0_16] : memref<128x128xf32, #tpu.memory_space<vmem>>, vector<128x128xf32>
      tpu.vector_store %arg6[%c0_15, %c0_16], %17 {strides = array<i32>} : memref<128x128xf32, #tpu.memory_space<vmem>>, vector<128x128xf32>,
    } else {
    }
    return
  }
  func.func @transform_0(%arg0: i32, %arg1: i32, %arg2: i32) -> (i32, i32) {
    %c0_i32 = arith.constant 0 : i32
    return %arg0, %arg2 : i32, i32
  }
  func.func @transform_1(%arg0: i32, %arg1: i32, %arg2: i32) -> (i32, i32) {
    %c0_i32 = arith.constant 0 : i32
    return %arg2, %arg1 : i32, i32
  }
  func.func @transform_2(%arg0: i32, %arg1: i32, %arg2: i32) -> (i32, i32) {
    %c0_i32 = arith.constant 0 : i32
    %c0_i32_0 = arith.constant 0 : i32
    return %c0_i32, %arg1 : i32, i32
  }
  func.func @transform_3(%arg0: i32, %arg1: i32, %arg2: i32) -> (i32, i32) {
    %c0_i32 = arith.constant 0 : i32
    return %arg0, %arg1 : i32, i32
  }
}

</mosaic_0001>

<bundles_post_ra>
// kernel: tpu_custom_call.1
= control target key start
LH: loop header
LB: loop body
LE: loop exit
PB: predicated region body
PF: predicated region fallthrough
CT: control target
= control target key end

     0   :  { %8 = vsyncpa [#allocation4], 0  ;;  %s814_s0 = inlined_call_operand.hbm [shape: bf16[128,256], index: 0, kind: input, shape index: {}]   ;;  %s815_s1 = inlined_call_operand.hbm [shape: bf16[256,128], index: 1, kind: input, shape index: {}]   ;;  %s816_s2 = inlined_call_operand.vmem [shape: f32[1,128], index: 2, kind: input, shape index: {}]   ;;  %s817_s3 = inlined_call_operand.hbm [shape: f32[128,128], index: 3, kind: output, shape index: {}]  }
   0x1   :  { %9 = vsyncpa [#allocation7], 0 }
   0x2   :  { %10 = vsyncpa [#allocation5], 0  ;;  %s751_s12 = smov [#allocation3]  }
   0x3   :  { %s16_s13 = sshll.u32 %s751_s12, 4  ;;  %s17_s13 = int_to_ptr.vmem [resolvable:$true] %s16_s13 }
   0x4   :  { %s693_s14 = scalar_lea.vmem %s17_s13, 2048  ;;  %p698_p1 = scmp.lt.s32.totalorder %s17_s13, %s17_s13 }
   0x5   :  { %p694_p0 = scmp.ne.s32.totalorder %s17_s13, %s693_s14  ;;  %p699_p2 = scmp.lt.s32.totalorder %s693_s14, %s693_s14 }
   0x7   :  { %p700_p3 = por %p699_p2, %p698_p1 }
   0x9   :  { %p701_p4 = pnand %p700_p3, %p694_p0 }
   0xb   :  { %704 = shalt.err (!%p701_p4)
}
   0xc   :  { %s752_s15 = smov 128   ;;  %s753_s16 = smov 8  }
   0xd   :  { %22 = dma.hbm_to_vmem [thread:$0]  %s814_s0, 2048, %s17_s13, [#allocation4], %s752_s15, %s752_s15, %s753_s16  }
   0xe   :  { %s754_s19 = smov [#allocation6]  }
   0xf   :  { %s28_s20 = sshll.u32 %s754_s19, 4  ;;  %s29_s20 = int_to_ptr.vmem [resolvable:$true] %s28_s20 }
  0x10   :  { %s713_s21 = scalar_lea.vmem %s29_s20, 2048  ;;  %p718_p6 = scmp.lt.s32.totalorder %s29_s20, %s29_s20 }
  0x11   :  { %p714_p5 = scmp.ne.s32.totalorder %s29_s20, %s713_s21  ;;  %p719_p7 = scmp.lt.s32.totalorder %s713_s21, %s713_s21 }
  0x13   :  { %p720_p8 = por %p719_p7, %p718_p6 }
  0x15   :  { %p721_p9 = pnand %p720_p8, %p714_p5 }
  0x17   :  { %724 = shalt.err (!%p721_p9)
}
  0x18   :  { %s755_s22 = smov 64   ;;  %s756_s23 = smov 4  }
  0x19   :  { %34 = dma.hbm_to_vmem [thread:$0]  %s815_s1, 2048, %s29_s20, [#allocation7], %s755_s22, %s755_s22, %s756_s23  }
  0x1a   :  { %745 = dma.done.wait [#allocation4], 2048  }
  0x1b   :  { %746 = vsyncadd [#allocation4], 4294965248 }
  0x1c   :  { %747 = dma.done.wait [#allocation7], 2048  }
  0x1d   :  { %748 = vsyncadd [#allocation7], 4294965248  ;;  %v645_v0 = vld [vmem:[#allocation6 + $0x78] sm:$0xff]   ;;  %v647_v2 = vld [vmem:[#allocation6 + $0x70] sm:$0xff]  }
  0x1e   :  { %v646_v1 = vld [vmem:[#allocation6 + $0x38] sm:$0xff]   ;;  %558 = vmatprep.subr.bf16.mxu0 %v645_v0  ;;  %622 = vmatprep.subr.bf16.mxu1 %v645_v0  ;;  %v648_v3 = vld [vmem:[#allocation6 + $0x30] sm:$0xff]   ;;  %v649_v4 = vld [vmem:[#allocation6 + $0x68] sm:$0xff]  }
  0x1f   :  { %559 = vmatpush3.bf16.msra.mxu0 %v646_v1  ;;  %630 = vmatpush3.bf16.msra.mxu1 %v646_v1  ;;  %v650_v5 = vld [vmem:[#allocation6 + $0x28] sm:$0xff]   ;;  %v651_v6 = vld [vmem:[#allocation6 + $0x60] sm:$0xff]   ;;  %v653_v8 = vld [vmem:[#allocation6 + $0x58] sm:$0xff]  }
  0x20   :  { %560 = vmatprep.subr.bf16.mxu0 %v647_v2  ;;  %623 = vmatprep.subr.bf16.mxu1 %v647_v2  ;;  %v652_v7 = vld [vmem:[#allocation6 + $0x20] sm:$0xff]   ;;  %v654_v9 = vld [vmem:[#allocation6 + $0x18] sm:$0xff]   ;;  %v655_v10 = vld [vmem:[#allocation6 + $0x50] sm:$0xff]  }
  0x21   :  { %v663_v11 = vld [vmem:[#allocation3 + $0x4] ss:$8 sps:$4 sm:$0xff]   ;;  %v656_v13 = vld [vmem:[#allocation6 + $0x10] sm:$0xff]   ;;  %v661_v18 = vld [vmem:[#allocation3] ss:$8 sps:$4 sm:$0xff]  }
  0x22   :  { %v666_v12 = vld [vmem:[#allocation3 + $0x44] ss:$8 sps:$4 sm:$0xff]   ;;  %336 = vmatprep.mubr.bf16.mxu0 %v663_v11  ;;  %v664_v19 = vld [vmem:[#allocation3 + $0x40] ss:$8 sps:$4 sm:$0xff]   ;;  %v667_v20 = vld [vmem:[#allocation3 + $0x14] ss:$8 sps:$4 sm:$0xff]  }
  0x23   :  { %561 = vmatpush3.bf16.msra.mxu0 %v648_v3  ;;  %631 = vmatpush3.bf16.msra.mxu1 %v648_v3  ;;  %v657_v14 = vld [vmem:[#allocation6 + $0x48] sm:$0xff]   ;;  %v659_v16 = vld [vmem:[#allocation6 + $0x40] sm:$0xff]   ;;  %v669_v21 = vld [vmem:[#allocation3 + $0x54] ss:$8 sps:$4 sm:$0xff]  }
  0x24   :  { %562 = vmatprep.subr.bf16.mxu0 %v649_v4  ;;  %624 = vmatprep.subr.bf16.mxu1 %v649_v4  ;;  %v658_v15 = vld [vmem:[#allocation6 + $0x8] sm:$0xff]   ;;  %v660_v17 = vld [vmem:[#allocation6] sm:$0xff]   ;;  %v671_v22 = vld [vmem:[#allocation3 + $0x10] ss:$8 sps:$4 sm:$0xff]  }
  0x25   :  { %368 = vmatprep.mubr.bf16.mxu1 %v666_v12  ;;  %v672_v23 = vld [vmem:[#allocation3 + $0x50] ss:$8 sps:$4 sm:$0xff]   ;;  %v673_v24 = vld [vmem:[#allocation3 + $0x24] ss:$8 sps:$4 sm:$0xff]   ;;  %v677_v26 = vld [vmem:[#allocation3 + $0x20] ss:$8 sps:$4 sm:$0xff]  }
  0x26   :  { %v675_v25 = vld [vmem:[#allocation3 + $0x64] ss:$8 sps:$4 sm:$0xff]   ;;  %v678_v27 = vld [vmem:[#allocation3 + $0x60] ss:$8 sps:$4 sm:$0xff]   ;;  %v679_v28 = vld [vmem:[#allocation3 + $0x34] ss:$8 sps:$4 sm:$0xff]  }
  0x27   :  { %563 = vmatpush3.bf16.msra.mxu0 %v650_v5  ;;  %632 = vmatpush3.bf16.msra.mxu1 %v650_v5  ;;  %v681_v29 = vld [vmem:[#allocation3 + $0x74] ss:$8 sps:$4 sm:$0xff]   ;;  %v683_v30 = vld [vmem:[#allocation3 + $0x30] ss:$8 sps:$4 sm:$0xff]   ;;  %v790_v35 = vld [vmem:[%s816_s2] ss:$0 sm:$0xff] }
  0x28   :  { %564 = vmatprep.subr.bf16.mxu0 %v651_v6  ;;  %625 = vmatprep.subr.bf16.mxu1 %v651_v6  ;;  %v684_v31 = vld [vmem:[#allocation3 + $0x70] ss:$8 sps:$4 sm:$0xff]   ;;  %s757_s2 = smov [#allocation8]  }
  0x29   :  { %s512_s26 = sshll.u32 %s757_s2, 4  ;;  %s513_s26 = int_to_ptr.vmem [resolvable:$true] %s512_s26 }
  0x2a   :  { %s725_s27 = scalar_lea.vmem %s513_s26, 2048  ;;  %p730_p11 = scmp.lt.s32.totalorder %s513_s26, %s513_s26 }
  0x2b   :  { %565 = vmatpush3.bf16.msra.mxu0 %v652_v7  ;;  %633 = vmatpush3.bf16.msra.mxu1 %v652_v7  ;;  %p726_p10 = scmp.ne.s32.totalorder %s513_s26, %s725_s27  ;;  %p731_p12 = scmp.lt.s32.totalorder %s725_s27, %s725_s27 }
  0x2c   :  { %566 = vmatprep.subr.bf16.mxu0 %v653_v8  ;;  %626 = vmatprep.subr.bf16.mxu1 %v653_v8 }
  0x2d   :  { %p732_p13 = por %p731_p12, %p730_p11 }
  0x2f   :  { %567 = vmatpush3.bf16.msra.mxu0 %v654_v9  ;;  %634 = vmatpush3.bf16.msra.mxu1 %v654_v9  ;;  %p733_p0 = pnand %p732_p13, %p726_p10 }
  0x30   :  { %568 = vmatprep.subr.bf16.mxu0 %v655_v10  ;;  %627 = vmatprep.subr.bf16.mxu1 %v655_v10 }
  0x33   :  { %569 = vmatpush3.bf16.msra.mxu0 %v656_v13  ;;  %635 = vmatpush3.bf16.msra.mxu1 %v656_v13 }
  0x34   :  { %570 = vmatprep.subr.bf16.mxu0 %v657_v14  ;;  %628 = vmatprep.subr.bf16.mxu1 %v657_v14 }
  0x37   :  { %571 = vmatpush3.bf16.msra.mxu0 %v658_v15  ;;  %636 = vmatpush3.bf16.msra.mxu1 %v658_v15 }
  0x38   :  { %572 = vmatprep.subr.bf16.mxu0 %v659_v16  ;;  %629 = vmatprep.subr.bf16.mxu1 %v659_v16 }
  0x3b   :  { %573 = vmatpush3.bf16.msra.mxu0 %v660_v17  ;;  %637 = vmatpush3.bf16.msra.mxu1 %v660_v17 }
  0x3e   :  { %337 = vmatmul.mubr.bf16.vlgmr.msra.gmra.mxu0 %v661_v18  ;;  %369 = vmatmul.mubr.bf16.vlgmr.msra.gmra.mxu1 %v664_v19 }
  0x3f   :  { %344 = vmatprep.mubr.bf16.mxu0 %v667_v20  ;;  %376 = vmatprep.mubr.bf16.mxu1 %v669_v21 }
  0x46   :  { %345 = vmatmul.mubr.bf16.gmra.mxu0 %v671_v22  ;;  %377 = vmatmul.mubr.bf16.gmra.mxu1 %v672_v23 }
  0x47   :  { %352 = vmatprep.mubr.bf16.mxu0 %v673_v24  ;;  %384 = vmatprep.mubr.bf16.mxu1 %v675_v25 }
  0x4e   :  { %353 = vmatmul.mubr.bf16.gmra.mxu0 %v677_v26  ;;  %385 = vmatmul.mubr.bf16.gmra.mxu1 %v678_v27 }
  0x4f   :  { %360 = vmatprep.mubr.bf16.mxu0 %v679_v28  ;;  %392 = vmatprep.mubr.bf16.mxu1 %v681_v29 }
  0x56   :  { %361 = vmatmul.mubr.bf16.gmra.mxu0 %v683_v30  ;;  %393 = vmatmul.mubr.bf16.gmra.mxu1 %v684_v31 }
  0xfe   :  { %v574_v32 = vpop.f32.mrf.mxu0  ;;  %v598_v33 = vpop.f32.mrf.mxu1 }
 0x100   :  { %v575_v34 = vpop.f32.mrf.mxu0  ;;  %v599_v36 = vpop.f32.mrf.mxu1 }
 0x101   :  { %v576_v37 = vadd.f32 %v575_v34, %v574_v32  ;;  %v600_v38 = vadd.f32 %v599_v36, %v598_v33 }
 0x102   :  { %v577_v39 = vpop.f32.mrf.mxu0  ;;  %v601_v40 = vpop.f32.mrf.mxu1 }
 0x103   :  { %v459_v41 = vadd.f32 %v576_v37, %v790_v35  ;;  %v467_v42 = vadd.f32 %v600_v38, %v790_v35 }
 0x104   :  { %v578_v43 = vpop.f32.mrf.mxu0  ;;  %v602_v44 = vpop.f32.mrf.mxu1 }
 0x105   :  { %v475_v45 = vmax.f32 %v459_v41, 0.0  ;;  %v483_v46 = vmax.f32 %v467_v42, 0.0  ;;  %v579_v47 = vadd.f32 %v578_v43, %v577_v39  ;;  %v603_v48 = vadd.f32 %v602_v44, %v601_v40 }
 0x106   :  { %v580_v49 = vpop.f32.mrf.mxu0  ;;  %v604_v50 = vpop.f32.mrf.mxu1 }
 0x107   :  { %491 = vst [vmem:[#allocation8] sm:$0xff] %v475_v45  ;;  %499 = vst [vmem:[#allocation8 + $0x40] sm:$0xff] %v483_v46  ;;  %v460_v51 = vadd.f32 %v579_v47, %v790_v35  ;;  %v468_v52 = vadd.f32 %v603_v48, %v790_v35 }
 0x108   :  { %v581_v53 = vpop.f32.mrf.mxu0  ;;  %v605_v54 = vpop.f32.mrf.mxu1 }
 0x109   :  { %v476_v55 = vmax.f32 %v460_v51, 0.0  ;;  %v484_v56 = vmax.f32 %v468_v52, 0.0  ;;  %v582_v57 = vadd.f32 %v581_v53, %v580_v49  ;;  %v606_v58 = vadd.f32 %v605_v54, %v604_v50 }
 0x10a   :  { %v583_v59 = vpop.f32.mrf.mxu0  ;;  %v607_v60 = vpop.f32.mrf.mxu1 }
 0x10b   :  { %492 = vst [vmem:[#allocation8 + $0x8] sm:$0xff] %v476_v55  ;;  %500 = vst [vmem:[#allocation8 + $0x48] sm:$0xff] %v484_v56  ;;  %v461_v61 = vadd.f32 %v582_v57, %v790_v35  ;;  %v469_v62 = vadd.f32 %v606_v58, %v790_v35 }
 0x10c   :  { %v584_v63 = vpop.f32.mrf.mxu0  ;;  %v608_v0 = vpop.f32.mrf.mxu1 }
 0x10d   :  { %v477_v1 = vmax.f32 %v461_v61, 0.0  ;;  %v485_v2 = vmax.f32 %v469_v62, 0.0  ;;  %v585_v3 = vadd.f32 %v584_v63, %v583_v59  ;;  %v609_v4 = vadd.f32 %v608_v0, %v607_v60 }
 0x10e   :  { %v586_v5 = vpop.f32.mrf.mxu0  ;;  %v610_v6 = vpop.f32.mrf.mxu1 }
 0x10f   :  { %493 = vst [vmem:[#allocation8 + $0x10] sm:$0xff] %v477_v1  ;;  %501 = vst [vmem:[#allocation8 + $0x50] sm:$0xff] %v485_v2  ;;  %v462_v7 = vadd.f32 %v585_v3, %v790_v35  ;;  %v470_v8 = vadd.f32 %v609_v4, %v790_v35 }
 0x110   :  { %v587_v9 = vpop.f32.mrf.mxu0  ;;  %v611_v10 = vpop.f32.mrf.mxu1 }
 0x111   :  { %v478_v11 = vmax.f32 %v462_v7, 0.0  ;;  %v486_v12 = vmax.f32 %v470_v8, 0.0  ;;  %v588_v13 = vadd.f32 %v587_v9, %v586_v5  ;;  %v612_v14 = vadd.f32 %v611_v10, %v610_v6 }
 0x112   :  { %v589_v15 = vpop.f32.mrf.mxu0  ;;  %v613_v16 = vpop.f32.mrf.mxu1 }
 0x113   :  { %494 = vst [vmem:[#allocation8 + $0x18] sm:$0xff] %v478_v11  ;;  %502 = vst [vmem:[#allocation8 + $0x58] sm:$0xff] %v486_v12  ;;  %v463_v17 = vadd.f32 %v588_v13, %v790_v35  ;;  %v471_v18 = vadd.f32 %v612_v14, %v790_v35 }
 0x114   :  { %v590_v19 = vpop.f32.mrf.mxu0  ;;  %v614_v20 = vpop.f32.mrf.mxu1 }
 0x115   :  { %v479_v21 = vmax.f32 %v463_v17, 0.0  ;;  %v487_v22 = vmax.f32 %v471_v18, 0.0  ;;  %v591_v23 = vadd.f32 %v590_v19, %v589_v15  ;;  %v615_v24 = vadd.f32 %v614_v20, %v613_v16 }
 0x116   :  { %v592_v25 = vpop.f32.mrf.mxu0  ;;  %v616_v26 = vpop.f32.mrf.mxu1 }
 0x117   :  { %495 = vst [vmem:[#allocation8 + $0x20] sm:$0xff] %v479_v21  ;;  %503 = vst [vmem:[#allocation8 + $0x60] sm:$0xff] %v487_v22  ;;  %v464_v27 = vadd.f32 %v591_v23, %v790_v35  ;;  %v472_v28 = vadd.f32 %v615_v24, %v790_v35 }
 0x118   :  { %v593_v29 = vpop.f32.mrf.mxu0  ;;  %v617_v30 = vpop.f32.mrf.mxu1 }
 0x119   :  { %v480_v31 = vmax.f32 %v464_v27, 0.0  ;;  %v488_v32 = vmax.f32 %v472_v28, 0.0  ;;  %v594_v33 = vadd.f32 %v593_v29, %v592_v25  ;;  %v618_v34 = vadd.f32 %v617_v30, %v616_v26 }
 0x11a   :  { %v595_v36 = vpop.f32.mrf.mxu0  ;;  %v619_v37 = vpop.f32.mrf.mxu1 }
 0x11b   :  { %496 = vst [vmem:[#allocation8 + $0x28] sm:$0xff] %v480_v31  ;;  %504 = vst [vmem:[#allocation8 + $0x68] sm:$0xff] %v488_v32  ;;  %v465_v38 = vadd.f32 %v594_v33, %v790_v35  ;;  %v473_v39 = vadd.f32 %v618_v34, %v790_v35 }
 0x11c   :  { %v596_v40 = vpop.f32.mrf.mxu0  ;;  %v620_v41 = vpop.f32.mrf.mxu1 }
 0x11d   :  { %v481_v42 = vmax.f32 %v465_v38, 0.0  ;;  %v489_v43 = vmax.f32 %v473_v39, 0.0  ;;  %v597_v44 = vadd.f32 %v596_v40, %v595_v36  ;;  %v621_v45 = vadd.f32 %v620_v41, %v619_v37 }
 0x11f   :  { %497 = vst [vmem:[#allocation8 + $0x30] sm:$0xff] %v481_v42  ;;  %505 = vst [vmem:[#allocation8 + $0x70] sm:$0xff] %v489_v43  ;;  %v466_v46 = vadd.f32 %v597_v44, %v790_v35  ;;  %v474_v47 = vadd.f32 %v621_v45, %v790_v35 }
 0x121   :  { %v482_v48 = vmax.f32 %v466_v46, 0.0  ;;  %v490_v49 = vmax.f32 %v474_v47, 0.0 }
 0x123   :  { %498 = vst [vmem:[#allocation8 + $0x38] sm:$0xff] %v482_v48  ;;  %506 = vst [vmem:[#allocation8 + $0x78] sm:$0xff] %v490_v49 }
 0x124   :  { %736 = shalt.err (!%p733_p0)
}
 0x125   :  { %518 = dma.vmem_to_hbm [thread:$0]  %s513_s26, 2048, %s817_s3, [#allocation5], %s752_s15, %s752_s15, %s753_s16  }
 0x126   :  { %749 = dma.done.wait [#allocation5], 2048  }
 0x127   :  { %750 = vsyncadd [#allocation5], 4294965248 }
 0x128   :  { %522 = vsyncpa [#allocation4], 1 }
 0x129   :  { %523 = vsyncpa [#allocation7], 1 }
 0x12a   :  { %524 = vsyncpa [#allocation5], 1 }

</bundles_post_ra>
